<compile_context>
chip_gen: v6e
topology: v6e:2x2x1
jax: 0.10.0
libtpu: 0.0.40
codegen_flags: <defaults>
</compile_context>

<pallas_src>
import functools

import jax
import jax.numpy as jnp
import numpy as np
from jax.experimental import pallas as pl
from jax.experimental.pallas import tpu as pltpu


def _round_up(x, m):
    return ((x + m - 1) // m) * m


def vmlp_kernel(x_ref, eps_ref, w_enc_ref, b_enc_ref, w_lm_ref, b_lm_ref, out_ref):
    # encoder Linear (the reference never applies the stored activation)
    h = jnp.dot(x_ref[...], w_enc_ref[...],
                preferred_element_type=jnp.float32) + b_enc_ref[...]

    # fused [0.5*logvar | mu] head: one MXU matmul with 2*Z output lanes.
    lm = jnp.dot(h, w_lm_ref[...],
                 preferred_element_type=jnp.float32) + b_lm_ref[...]
    Zd = w_lm_ref.shape[1] // 2
    std = jnp.exp(lm[:, :Zd])        # 0.5 already folded into w_lm/b_lm at prep time
    mu = lm[:, Zd:]

    z = eps_ref[...] * mu + std      # reparameterization exactly as in the module

    # single fused output slab: [ z | logvar | mu ]  -> one writeback stream
    out_ref[...] = jnp.concatenate([z, std, mu], axis=1)


def prepare_params(raw):
    """One-time parameter prep (call once, NOT per forward):
       - fuse logvar/mu heads along the output (lane) dimension,
       - fold the 0.5 of (0.5 * logvar_encoder(x)).exp() into the fused weights/bias."""
    w_enc = jnp.asarray(raw["w_enc"], jnp.float32)
    b_enc = jnp.asarray(raw["b_enc"], jnp.float32).reshape(1, -1)
    w_lm = jnp.concatenate(
        [0.5 * jnp.asarray(raw["w_logvar"], jnp.float32),
         jnp.asarray(raw["w_mu"], jnp.float32)], axis=1)
    b_lm = jnp.concatenate(
        [0.5 * jnp.asarray(raw["b_logvar"], jnp.float32).reshape(1, -1),
         jnp.asarray(raw["b_mu"], jnp.float32).reshape(1, -1)], axis=1)
    return {"w_enc": w_enc, "b_enc": b_enc, "w_lm": w_lm, "b_lm": b_lm}


@functools.partial(jax.jit, static_argnames=("block_rows",))
def variational_mlp_forward(x, eps, prepped, *, block_rows=512):
    N, D_in = x.shape
    H = prepped["w_enc"].shape[1]
    Z = prepped["w_lm"].shape[1] // 2

    # Large row tile amortizes the ~0.35us per-grid-step overhead.  Pad the batch
    # up to a tile multiple instead of one whole-batch resident block so VMEM use
    # stays ~2 x tm x row_bytes even at huge N (safe on v7x's 64 MiB VMEM).
    tm = min(_round_up(block_rows, 8), _round_up(N, 8))
    n_pad = _round_up(N, tm)
    if n_pad != N:
        x = jnp.pad(x, ((0, n_pad - N), (0, 0)))
        eps = jnp.pad(eps, ((0, n_pad - N), (0, 0)))
    grid = (n_pad // tm,)

    # Split across TensorCores (v7x) only when each core gets >= 2 tiles.
    dim_sem = ("parallel",) if grid[0] >= 4 else ("arbitrary",)

    # VMEM budget from actual footprint: resident weights + double-buffered tiles
    # (x, eps, fused out), f32, with 2x headroom; clamped to v7x's 64 MiB.
    weight_f32 = D_in * H + H + H * 2 * Z + 2 * Z
    tile_f32 = 2 * tm * (D_in + Z + 3 * Z)
    vmem_bytes = int(min(64 * 1024 * 1024,
                         max(2 * 1024 * 1024, 2 * 4 * (weight_f32 + tile_f32))))

    def row_spec(cols):
        return pl.BlockSpec((tm, cols), lambda i: (i, 0))

    def full_spec(shape):
        return pl.BlockSpec(shape, lambda i: (0, 0))

    out = pl.pallas_call(
        vmlp_kernel,
        out_shape=jax.ShapeDtypeStruct((n_pad, 3 * Z), jnp.float32),
        grid=grid,
        in_specs=[
            row_spec(D_in),            # x    (tiled over batch)
            row_spec(Z),               # eps  (tiled over batch)
            full_spec((D_in, H)),      # encoder weight (resident)
            full_spec((1, H)),         # encoder bias
            full_spec((H, 2 * Z)),     # fused [0.5*logvar | mu] weight
            full_spec((1, 2 * Z)),     # fused bias
        ],
        out_specs=row_spec(3 * Z),     # fused [z | logvar | mu] slab
        compiler_params=pltpu.CompilerParams(
            dimension_semantics=dim_sem,
            vmem_limit_bytes=vmem_bytes,
        ),
    )(x, eps, prepped["w_enc"], prepped["b_enc"], prepped["w_lm"], prepped["b_lm"])

    z = out[:N, :Z]
    logvar = out[:N, Z:2 * Z]
    mu = out[:N, 2 * Z:]
    return z, logvar, mu


def variational_mlp_reference(x, eps, raw):
    # pure-JAX reference mirroring the PyTorch forward
    h = x @ raw["w_enc"] + raw["b_enc"]
    logvar = jnp.exp(0.5 * (h @ raw["w_logvar"] + raw["b_logvar"]))
    mu = h @ raw["w_mu"] + raw["b_mu"]
    z = eps * mu + logvar
    return z, logvar, mu


if __name__ == "__main__":
    # small shapes consistent with the module
    N = 64        # batch
    D_IN = 16     # in_features
    H = 32        # hidden_dim
    Z = 8         # z_dim

    key = jax.random.PRNGKey(0)
    ks = jax.random.split(key, 8)

    raw = {
        "w_enc":    jax.random.normal(ks[0], (D_IN, H), jnp.float32) * 0.1,
        "b_enc":    jax.random.normal(ks[1], (H,), jnp.float32) * 0.1,
        "w_logvar": jax.random.normal(ks[2], (H, Z), jnp.float32) * 0.1,
        "b_logvar": jax.random.normal(ks[3], (Z,), jnp.float32) * 0.1,
        "w_mu":     jax.random.normal(ks[4], (H, Z), jnp.float32) * 0.1,
        "b_mu":     jax.random.normal(ks[5], (Z,), jnp.float32) * 0.1,
    }

    x = jax.random.normal(ks[6], (N, D_IN), jnp.float32)
    # TODO(synk): eps (torch.randn_like(mu)) could be generated in-kernel with
    # pltpu.prng_seed/prng_random_bits to drop one input DMA stream; kept
    # host-side here so the kernel is deterministic and comparable to the ref.
    eps = jax.random.normal(ks[7], (N, Z), jnp.float32)

    prepped = prepare_params(raw)   # one-time prep, outside the call path

    z, logvar, mu = jax.block_until_ready(variational_mlp_forward(x, eps, prepped))
    z_r, logvar_r, mu_r = jax.block_until_ready(variational_mlp_reference(x, eps, raw))

    np.testing.assert_allclose(np.asarray(z), np.asarray(z_r), rtol=1e-5, atol=1e-5)
    np.testing.assert_allclose(np.asarray(logvar), np.asarray(logvar_r), rtol=1e-5, atol=1e-5)
    np.testing.assert_allclose(np.asarray(mu), np.asarray(mu_r), rtol=1e-5, atol=1e-5)

    print("KERNEL_OK")
</pallas_src>

<mosaic_0001>
module attributes {stable_mosaic.version = 11 : i64} {
  func.func @vmlp_kernel(%arg0: i32, %arg1: memref<64x16xf32, #tpu.memory_space<vmem>>, %arg2: memref<64x8xf32, #tpu.memory_space<vmem>>, %arg3: memref<16x32xf32, #tpu.memory_space<vmem>>, %arg4: memref<1x32xf32, #tpu.memory_space<vmem>>, %arg5: memref<32x16xf32, #tpu.memory_space<vmem>>, %arg6: memref<1x16xf32, #tpu.memory_space<vmem>>, %arg7: memref<64x24xf32, #tpu.memory_space<vmem>>) attributes {dimension_semantics = [#tpu.dimension_semantics<arbitrary>], iteration_bounds = array<i64: 1>, scalar_prefetch = 0 : i64, scratch_operands = 0 : i64, tpu.core_type = #tpu.core_type<tc>, window_params = [{transform_indices = @transform_0, window_bounds = array<i64: 64, 16>}, {transform_indices = @transform_1, window_bounds = array<i64: 64, 8>}, {pipeline_mode = #tpu.pipeline_mode<synchronous>, transform_indices = @transform_2, window_bounds = array<i64: 16, 32>}, {pipeline_mode = #tpu.pipeline_mode<synchronous>, transform_indices = @transform_3, window_bounds = array<i64: 1, 32>}, {pipeline_mode = #tpu.pipeline_mode<synchronous>, transform_indices = @transform_4, window_bounds = array<i64: 32, 16>}, {pipeline_mode = #tpu.pipeline_mode<synchronous>, transform_indices = @transform_5, window_bounds = array<i64: 1, 16>}, {transform_indices = @transform_6, window_bounds = array<i64: 64, 24>}]} {
    %c0 = arith.constant 0 : index
    %c0_0 = arith.constant 0 : index
    %0 = vector.load %arg1[%c0, %c0_0] : memref<64x16xf32, #tpu.memory_space<vmem>>, vector<64x16xf32>
    %c0_1 = arith.constant 0 : index
    %c0_2 = arith.constant 0 : index
    %1 = vector.load %arg3[%c0_1, %c0_2] : memref<16x32xf32, #tpu.memory_space<vmem>>, vector<16x32xf32>
    %cst = arith.constant dense<0.000000e+00> : vector<64x32xf32>
    %2 = tpu.matmul %0, %1, %cst {dimension_numbers = #tpu.dot_dimension_numbers<[1], [0], [0], [1], [0, 0, 1, 1], [], []>} : vector<64x16xf32>, vector<16x32xf32>, vector<64x32xf32> -> vector<64x32xf32>
    %c0_3 = arith.constant 0 : index
    %c0_4 = arith.constant 0 : index
    %3 = vector.load %arg4[%c0_3, %c0_4] : memref<1x32xf32, #tpu.memory_space<vmem>>, vector<1x32xf32>
    %4 = vector.broadcast %3 : vector<1x32xf32> to vector<64x32xf32>
    %5 = arith.addf %2, %4 : vector<64x32xf32>
    %c0_5 = arith.constant 0 : index
    %c0_6 = arith.constant 0 : index
    %6 = vector.load %arg5[%c0_5, %c0_6] : memref<32x16xf32, #tpu.memory_space<vmem>>, vector<32x16xf32>
    %cst_7 = arith.constant dense<0.000000e+00> : vector<64x16xf32>
    %7 = tpu.matmul %5, %6, %cst_7 {dimension_numbers = #tpu.dot_dimension_numbers<[1], [0], [0], [1], [0, 0, 1, 1], [], []>} : vector<64x32xf32>, vector<32x16xf32>, vector<64x16xf32> -> vector<64x16xf32>
    %c0_8 = arith.constant 0 : index
    %c0_9 = arith.constant 0 : index
    %8 = vector.load %arg6[%c0_8, %c0_9] : memref<1x16xf32, #tpu.memory_space<vmem>>, vector<1x16xf32>
    %9 = vector.broadcast %8 : vector<1x16xf32> to vector<64x16xf32>
    %10 = arith.addf %7, %9 : vector<64x16xf32>
    %11 = vector.extract_strided_slice %10 {offsets = [0, 0], sizes = [64, 8], strides = [1, 1]} : vector<64x16xf32> to vector<64x8xf32>
    %12 = math.exp %11 : vector<64x8xf32>
    %13 = vector.extract_strided_slice %10 {offsets = [0, 8], sizes = [64, 8], strides = [1, 1]} : vector<64x16xf32> to vector<64x8xf32>
    %c0_10 = arith.constant 0 : index
    %c0_11 = arith.constant 0 : index
    %14 = vector.load %arg2[%c0_10, %c0_11] : memref<64x8xf32, #tpu.memory_space<vmem>>, vector<64x8xf32>
    %15 = arith.mulf %14, %13 : vector<64x8xf32>
    %16 = arith.addf %15, %12 : vector<64x8xf32>
    %17 = tpu.concatenate %16, %12, %13 in 1 : vector<64x8xf32>, vector<64x8xf32>, vector<64x8xf32> -> vector<64x24xf32>
    %c0_12 = arith.constant 0 : index
    %c0_13 = arith.constant 0 : index
    %18 = vector.load %arg7[%c0_12, %c0_13] : memref<64x24xf32, #tpu.memory_space<vmem>>, vector<64x24xf32>
    tpu.vector_store %arg7[%c0_12, %c0_13], %17 {strides = array<i32>} : memref<64x24xf32, #tpu.memory_space<vmem>>, vector<64x24xf32>,
    return
  }
  func.func @transform_0(%arg0: i32) -> (i32, i32) {
    %c0_i32 = arith.constant 0 : i32
    %c0_i32_0 = arith.constant 0 : i32
    return %arg0, %c0_i32 : i32, i32
  }
  func.func @transform_1(%arg0: i32) -> (i32, i32) {
    %c0_i32 = arith.constant 0 : i32
    %c0_i32_0 = arith.constant 0 : i32
    return %arg0, %c0_i32 : i32, i32
  }
  func.func @transform_2(%arg0: i32) -> (i32, i32) {
    %c0_i32 = arith.constant 0 : i32
    %c0_i32_0 = arith.constant 0 : i32
    %c0_i32_1 = arith.constant 0 : i32
    return %c0_i32, %c0_i32_0 : i32, i32
  }
  func.func @transform_3(%arg0: i32) -> (i32, i32) {
    %c0_i32 = arith.constant 0 : i32
    %c0_i32_0 = arith.constant 0 : i32
    %c0_i32_1 = arith.constant 0 : i32
    return %c0_i32, %c0_i32_0 : i32, i32
  }
  func.func @transform_4(%arg0: i32) -> (i32, i32) {
    %c0_i32 = arith.constant 0 : i32
    %c0_i32_0 = arith.constant 0 : i32
    %c0_i32_1 = arith.constant 0 : i32
    return %c0_i32, %c0_i32_0 : i32, i32
  }
  func.func @transform_5(%arg0: i32) -> (i32, i32) {
    %c0_i32 = arith.constant 0 : i32
    %c0_i32_0 = arith.constant 0 : i32
    %c0_i32_1 = arith.constant 0 : i32
    return %c0_i32, %c0_i32_0 : i32, i32
  }
  func.func @transform_6(%arg0: i32) -> (i32, i32) {
    %c0_i32 = arith.constant 0 : i32
    %c0_i32_0 = arith.constant 0 : i32
    return %arg0, %c0_i32 : i32, i32
  }
}

</mosaic_0001>

<bundles_post_ra>
// kernel: variational_mlp_forward.1
= control target key start
LH: loop header
LB: loop body
LE: loop exit
PB: predicated region body
PF: predicated region fallthrough
CT: control target
= control target key end

     0   :  { %vm40_vm0 = vcmask 130048   ;;  %vm181_vm1 = vcmask 261120   ;;  %s563_s25 = smov 8   ;;  %s564_s26 = smov 120   ;;  %vm439_vm2 = vcmask 64512   ;;  %vm456_vm3 = vcmask 195584   ;;  %s768_s2 = inlined_call_operand.vmem [shape: f32[16,32], index: 2, kind: input, shape index: {}]   ;;  %s769_s0 = inlined_call_operand.vmem [shape: f32[64,16], index: 0, kind: input, shape index: {}]   ;;  %s770_s4 = inlined_call_operand.vmem [shape: f32[32,16], index: 4, kind: input, shape index: {}]   ;;  %s771_s3 = inlined_call_operand.vmem [shape: f32[1,32], index: 3, kind: input, shape index: {}]   ;;  %s772_s5 = inlined_call_operand.vmem [shape: f32[1,16], index: 5, kind: input, shape index: {}]   ;;  %s773_s1 = inlined_call_operand.vmem [shape: f32[64,8], index: 1, kind: input, shape index: {}]   ;;  %s774_s6 = inlined_call_operand.vmem [shape: f32[64,24], index: 6, kind: output, shape index: {}]  }
   0x1   :  { %v32_v0 = vld [vmem:[%s768_s2 + $0x8] sm:$0xff]  ;;  %v31_v1 = vld [vmem:[%s768_s2] sm:$0xff]  ;;  %v25_v4 = vld [vmem:[%s769_s0 + $0x10] sm:$0xff] }
   0x2   :  { %v23_v2 = vld [vmem:[%s769_s0] sm:$0xff]  ;;  %509 = vmatprep.subr.mxu0 %v32_v0  ;;  %v24_v3 = vld [vmem:[%s769_s0 + $0x8] sm:$0xff]  ;;  %v173_v5 = vld [vmem:[%s770_s4 + $0x18] sm:$0xff] }
   0x3   :  { %513 = vmatprep.mubr.msk.f32.mxu0 %vm40_vm0, %v23_v2  ;;  %510 = vmatpush3.msra.mxu0 %v32_v0  ;;  %v26_v6 = vld [vmem:[%s769_s0 + $0x18] sm:$0xff]  ;;  %v27_v7 = vld [vmem:[%s769_s0 + $0x20] sm:$0xff]  ;;  %v28_v8 = vld [vmem:[%s769_s0 + $0x28] sm:$0xff] }
   0x4   :  { %511 = vmatprep.subr.mxu0 %v31_v1  ;;  %525 = vmatprep.subr.mxu1 %v173_v5  ;;  %v29_v9 = vld [vmem:[%s769_s0 + $0x30] sm:$0xff]  ;;  %v30_v10 = vld [vmem:[%s769_s0 + $0x38] sm:$0xff]  ;;  %v171_v12 = vld [vmem:[%s770_s4 + $0x8] sm:$0xff] }
   0x5   :  { %512 = vmatpush3.msra.mxu0 %v31_v1  ;;  %526 = vmatpush3.msra.mxu1 %v173_v5  ;;  %v172_v11 = vld [vmem:[%s770_s4 + $0x10] sm:$0xff]  ;;  %v170_v13 = vld [vmem:[%s770_s4] sm:$0xff] }
   0x6   :  { %514 = vmatmul.mubr.msk.f32.vlgmr.msra.gmra.mxu0 %vm40_vm0, %v24_v3  ;;  %527 = vmatprep.subr.mxu1 %v172_v11  ;;  %v469_v15 = vld [vmem:[%s771_s3] ss:$0 sm:$0xff] }
   0x7   :  { %516 = vmatprep.mubr.msk.f32.mxu0 %vm40_vm0, %v25_v4  ;;  %528 = vmatpush3.msra.mxu1 %v172_v11  ;;  %v478_v31 = vld [vmem:[%s772_s5] ss:$0 sm:$0xff] }
   0x8   :  { %529 = vmatprep.subr.mxu1 %v171_v12  ;;  %v327_v11 = vld [vmem:[%s773_s1] sm:$0xff] }
   0x9   :  { %530 = vmatpush3.msra.mxu1 %v171_v12 }
   0xa   :  { %517 = vmatmul.mubr.msk.f32.gmra.mxu0 %vm40_vm0, %v26_v6  ;;  %531 = vmatprep.subr.mxu1 %v170_v13 }
   0xb   :  { %519 = vmatprep.mubr.msk.f32.mxu0 %vm40_vm0, %v27_v7  ;;  %532 = vmatpush3.msra.mxu1 %v170_v13 }
   0xe   :  { %520 = vmatmul.mubr.msk.f32.gmra.mxu0 %vm40_vm0, %v28_v8 }
   0xf   :  { %522 = vmatprep.mubr.msk.f32.mxu0 %vm40_vm0, %v29_v9 }
  0x12   :  { %523 = vmatmul.mubr.msk.f32.gmra.mxu0 %vm40_vm0, %v30_v10  ;;  %v328_v10 = vld [vmem:[%s773_s1 + $0x8] sm:$0xff] }
  0xc6   :  { %v515_v14 = vpop.f32.mrf.mxu0 }
  0xc7   :  { %v137_v18 = vadd.f32 %v515_v14, %v469_v15 }
  0xc8   :  { %v131_v16 = vpop.f32.mrf.mxu0 }
  0xc9   :  { %v132_v17 = vadd.f32 %v469_v15, %v131_v16  ;;  %v330_v16 = vld [vmem:[%s773_s1 + $0x18] sm:$0xff] }
  0xca   :  { %v518_v19 = vpop.f32.mrf.mxu0 }
  0xcb   :  { %533 = vmatprep.mubr.msk.f32.mxu1 %vm181_vm1, %v132_v17  ;;  %v147_v22 = vadd.f32 %v518_v19, %v469_v15  ;;  %v329_v17 = vld [vmem:[%s773_s1 + $0x10] sm:$0xff] }
  0xcc   :  { %v141_v20 = vpop.f32.mrf.mxu0  ;;  %534 = vmatmul.mubr.msk.f32.vlgmr.msra.gmra.mxu1 %vm181_vm1, %v137_v18 }
  0xcd   :  { %v142_v21 = vadd.f32 %v469_v15, %v141_v20 }
  0xce   :  { %v521_v23 = vpop.f32.mrf.mxu0 }
  0xcf   :  { %536 = vmatprep.mubr.msk.f32.mxu1 %vm181_vm1, %v142_v21  ;;  %v157_v24 = vadd.f32 %v521_v23, %v469_v15 }
  0xd0   :  { %537 = vmatmul.mubr.msk.f32.gmra.mxu1 %vm181_vm1, %v147_v22  ;;  %v151_v25 = vpop.f32.mrf.mxu0 }
  0xd1   :  { %v152_v26 = vadd.f32 %v469_v15, %v151_v25  ;;  %v331_v25 = vld [vmem:[%s773_s1 + $0x20] sm:$0xff] }
  0xd2   :  { %v524_v27 = vpop.f32.mrf.mxu0 }
  0xd3   :  { %539 = vmatprep.mubr.msk.f32.mxu1 %vm181_vm1, %v152_v26  ;;  %v167_v28 = vadd.f32 %v524_v27, %v469_v15 }
  0xd4   :  { %540 = vmatmul.mubr.msk.f32.gmra.mxu1 %vm181_vm1, %v157_v24  ;;  %v161_v29 = vpop.f32.mrf.mxu0  ;;  %v332_v24 = vld [vmem:[%s773_s1 + $0x28] sm:$0xff] }
  0xd5   :  { %v162_v30 = vadd.f32 %v469_v15, %v161_v29 }
  0xd7   :  { %542 = vmatprep.mubr.msk.f32.mxu1 %vm181_vm1, %v162_v30 }
  0xd8   :  { %543 = vmatmul.mubr.msk.f32.gmra.mxu1 %vm181_vm1, %v167_v28 }
 0x18c   :  { %v535_v32 = vpop.f32.mrf.mxu1 }
 0x18d   :  { %v278_v33 = vadd.f32 %v535_v32, %v478_v31 }
 0x18e   :  { %v272_v34 = vpop.f32.mrf.mxu1 }
 0x18f   :  { %417 = vrot.lane.b32.xlu1 %v278_v33, %s563_s25  ;;  %345 = vrot.lane.b32.xlu0 %v278_v33, %s564_s26  ;;  %v273_v36 = vadd.f32 %v478_v31, %v272_v34  ;;  %v313_v40 = vmul.f32 1.442695, %v278_v33 }
 0x190   :  { %v538_v35 = vpop.f32.mrf.mxu1 }
 0x191   :  { %v288_v37 = vadd.f32 %v538_v35, %v478_v31  ;;  %v311_v42 = vmul.f32 1.442695, %v273_v36  ;;  %547 = vpow2.f32 %v313_v40 }
 0x192   :  { %v282_v38 = vpop.f32.mrf.mxu1 }
 0x193   :  { %349 = vrot.lane.b32.xlu1 %v288_v37, %s564_s26  ;;  %343 = vrot.lane.b32.xlu0 %v273_v36, %s564_s26  ;;  %v283_v43 = vadd.f32 %v478_v31, %v282_v38  ;;  %v317_v45 = vmul.f32 1.442695, %v288_v37  ;;  %549 = vpow2.f32 %v311_v42 }
 0x194   :  { %v541_v39 = vpop.f32.mrf.mxu1 }
 0x195   :  { %v298_v46 = vadd.f32 %v541_v39, %v478_v31  ;;  %v315_v47 = vmul.f32 1.442695, %v283_v43  ;;  %551 = vpow2.f32 %v317_v45  ;;  %v333_v45 = vld [vmem:[%s773_s1 + $0x30] sm:$0xff] }
 0x196   :  { %v292_v41 = vpop.f32.mrf.mxu1 }
 0x197   :  { %421 = vrot.lane.b32.xlu1 %v288_v37, %s563_s25  ;;  %415 = vrot.lane.b32.xlu0 %v273_v36, %s563_s25  ;;  %v293_v48 = vadd.f32 %v478_v31, %v292_v41  ;;  %v321_v50 = vmul.f32 1.442695, %v298_v46  ;;  %553 = vpow2.f32 %v315_v47 }
 0x198   :  { %v544_v44 = vpop.f32.mrf.mxu1 }
 0x199   :  { %v308_v51 = vadd.f32 %v544_v44, %v478_v31  ;;  %v319_v52 = vmul.f32 1.442695, %v293_v48  ;;  %555 = vpow2.f32 %v321_v50  ;;  %v334_v44 = vld [vmem:[%s773_s1 + $0x38] sm:$0xff] }
 0x19a   :  { %v302_v49 = vpop.f32.mrf.mxu1 }
 0x19b   :  { %347 = vrot.lane.b32.xlu1 %v283_v43, %s564_s26  ;;  %419 = vrot.lane.b32.xlu0 %v283_v43, %s563_s25  ;;  %v303_v53 = vadd.f32 %v478_v31, %v302_v49  ;;  %v325_v54 = vmul.f32 1.442695, %v308_v51  ;;  %557 = vpow2.f32 %v319_v52 }
 0x19d   :  { %v323_v55 = vmul.f32 1.442695, %v303_v53  ;;  %559 = vpow2.f32 %v325_v54 }
 0x19e   :  { %v548_v56 = vpop.eup %547 }
 0x19f   :  { %353 = vrot.lane.b32.xlu1 %v298_v46, %s564_s26  ;;  %351 = vrot.lane.b32.xlu0 %v293_v48, %s564_s26  ;;  %561 = vpow2.f32 %v323_v55 }
 0x1a0   :  { %v550_v57 = vpop.eup %549 }
 0x1a2   :  { %v552_v58 = vpop.eup %551 }
 0x1a3   :  { %425 = vrot.lane.b32.xlu1 %v298_v46, %s563_s25  ;;  %423 = vrot.lane.b32.xlu0 %v293_v48, %s563_s25 }
 0x1a4   :  { %v554_v59 = vpop.eup %553 }
 0x1a6   :  { %v556_v60 = vpop.eup %555 }
 0x1a7   :  { %357 = vrot.lane.b32.xlu1 %v308_v51, %s564_s26  ;;  %355 = vrot.lane.b32.xlu0 %v303_v53, %s564_s26 }
 0x1a8   :  { %v558_v61 = vpop.eup %557 }
 0x1aa   :  { %v684_v62 = vpop.eup %559 }
 0x1ab   :  { %393 = vrot.lane.b32.xlu1 %v548_v56, %s563_s25  ;;  %391 = vrot.lane.b32.xlu0 %v550_v57, %s563_s25 }
 0x1ac   :  { %v686_v63 = vpop.eup %561 }
 0x1af   :  { %397 = vrot.lane.b32.xlu1 %v552_v58, %s563_s25  ;;  %395 = vrot.lane.b32.xlu0 %v554_v59, %s563_s25 }
 0x1b3   :  { %401 = vrot.lane.b32.xlu1 %v556_v60, %s563_s25  ;;  %399 = vrot.lane.b32.xlu0 %v558_v61, %s563_s25 }
 0x1b7   :  { %405 = vrot.lane.b32.xlu1 %v684_v62, %s563_s25  ;;  %403 = vrot.lane.b32.xlu0 %v686_v63, %s563_s25 }
 0x1bb   :  { %429 = vrot.lane.b32.xlu1 %v308_v51, %s563_s25  ;;  %427 = vrot.lane.b32.xlu0 %v303_v53, %s563_s25 }
 0x201   :  { %v418_v0 = vpop.permute.xlu1 %417  ;;  %v346_v1 = vpop.permute.xlu0 %345 }
 0x202   :  { %v368_v14 = vmul.f32 %v346_v1, %v328_v10 }
 0x204   :  { %v376_v20 = vadd.f32 %v548_v56, %v368_v14 }
 0x205   :  { %v350_v2 = vpop.permute.xlu1 %349  ;;  %v344_v3 = vpop.permute.xlu0 %343 }
 0x206   :  { %v367_v15 = vmul.f32 %v344_v3, %v327_v11  ;;  %v370_v21 = vmul.f32 %v350_v2, %v330_v16 }
 0x208   :  { %v375_v22 = vadd.f32 %v550_v57, %v367_v15  ;;  %v378_v32 = vadd.f32 %v552_v58, %v370_v21 }
 0x209   :  { %v422_v4 = vpop.permute.xlu1 %421  ;;  %v416_v5 = vpop.permute.xlu0 %415 }
 0x20d   :  { %v348_v6 = vpop.permute.xlu1 %347  ;;  %v420_v7 = vpop.permute.xlu0 %419 }
 0x20e   :  { %v369_v23 = vmul.f32 %v348_v6, %v329_v17 }
 0x210   :  { %v377_v33 = vadd.f32 %v554_v59, %v369_v23 }
 0x211   :  { %v354_v8 = vpop.permute.xlu1 %353  ;;  %v352_v9 = vpop.permute.xlu0 %351 }
 0x212   :  { %v372_v34 = vmul.f32 %v354_v8, %v332_v24  ;;  %v371_v35 = vmul.f32 %v352_v9, %v331_v25 }
 0x214   :  { %v380_v42 = vadd.f32 %v556_v60, %v372_v34  ;;  %v379_v43 = vadd.f32 %v558_v61, %v371_v35 }
 0x215   :  { %v426_v12 = vpop.permute.xlu1 %425  ;;  %v424_v13 = vpop.permute.xlu0 %423 }
 0x219   :  { %v358_v18 = vpop.permute.xlu1 %357  ;;  %v356_v19 = vpop.permute.xlu0 %355 }
 0x21a   :  { %v374_v50 = vmul.f32 %v358_v18, %v334_v44  ;;  %v373_v51 = vmul.f32 %v356_v19, %v333_v45 }
 0x21c   :  { %v382_v56 = vadd.f32 %v684_v62, %v374_v50  ;;  %v381_v57 = vadd.f32 %v686_v63, %v373_v51 }
 0x21d   :  { %v394_v26 = vpop.permute.xlu1 %393  ;;  %v392_v27 = vpop.permute.xlu0 %391 }
 0x21e   :  { %v441_v28 = vsel %vm439_vm2, %v376_v20, %v394_v26  ;;  %v440_v29 = vsel %vm439_vm2, %v375_v22, %v392_v27 }
 0x21f   :  { %v449_v30 = vsel %vm40_vm0, %v441_v28, %v418_v0  ;;  %v448_v31 = vsel %vm40_vm0, %v440_v29, %v416_v5 }
 0x220   :  { %458 = vst.msk [vmem:[%s774_s6 + $0x8] sm:$0xff] %vm456_vm3, %v449_v30  ;;  %457 = vst.msk [vmem:[%s774_s6] sm:$0xff] %vm456_vm3, %v448_v31 }
 0x221   :  { %v398_v36 = vpop.permute.xlu1 %397  ;;  %v396_v37 = vpop.permute.xlu0 %395 }
 0x222   :  { %v443_v38 = vsel %vm439_vm2, %v378_v32, %v398_v36  ;;  %v442_v39 = vsel %vm439_vm2, %v377_v33, %v396_v37 }
 0x223   :  { %v451_v40 = vsel %vm40_vm0, %v443_v38, %v422_v4  ;;  %v450_v41 = vsel %vm40_vm0, %v442_v39, %v420_v7 }
 0x224   :  { %460 = vst.msk [vmem:[%s774_s6 + $0x18] sm:$0xff] %vm456_vm3, %v451_v40  ;;  %459 = vst.msk [vmem:[%s774_s6 + $0x10] sm:$0xff] %vm456_vm3, %v450_v41 }
 0x225   :  { %v402_v46 = vpop.permute.xlu1 %401  ;;  %v400_v47 = vpop.permute.xlu0 %399 }
 0x226   :  { %v445_v48 = vsel %vm439_vm2, %v380_v42, %v402_v46  ;;  %v444_v49 = vsel %vm439_vm2, %v379_v43, %v400_v47 }
 0x227   :  { %v453_v52 = vsel %vm40_vm0, %v445_v48, %v426_v12  ;;  %v452_v53 = vsel %vm40_vm0, %v444_v49, %v424_v13 }
 0x228   :  { %462 = vst.msk [vmem:[%s774_s6 + $0x28] sm:$0xff] %vm456_vm3, %v453_v52  ;;  %461 = vst.msk [vmem:[%s774_s6 + $0x20] sm:$0xff] %vm456_vm3, %v452_v53 }
 0x229   :  { %v406_v54 = vpop.permute.xlu1 %405  ;;  %v404_v55 = vpop.permute.xlu0 %403 }
 0x22a   :  { %v447_v58 = vsel %vm439_vm2, %v382_v56, %v406_v54  ;;  %v446_v59 = vsel %vm439_vm2, %v381_v57, %v404_v55 }
 0x22d   :  { %v430_v60 = vpop.permute.xlu1 %429  ;;  %v428_v61 = vpop.permute.xlu0 %427 }
 0x22e   :  { %v455_v0 = vsel %vm40_vm0, %v447_v58, %v430_v60  ;;  %v454_v1 = vsel %vm40_vm0, %v446_v59, %v428_v61 }
 0x22f   :  { %464 = vst.msk [vmem:[%s774_s6 + $0x38] sm:$0xff] %vm456_vm3, %v455_v0  ;;  %463 = vst.msk [vmem:[%s774_s6 + $0x30] sm:$0xff] %vm456_vm3, %v454_v1 }

</bundles_post_ra>
